<compile_context>
chip_gen: v7x
topology: tpu7x:2x2x1
jax: 0.10.0
libtpu: 0.0.40
codegen_flags: <defaults>
</compile_context>

<pallas_src>
import functools
import numpy as np

import jax
import jax.numpy as jnp
from jax.experimental import pallas as pl
from jax.experimental.pallas import tpu as pltpu

BN_EPS = 1e-5
# BatchNorm1d(affine=False), eval mode, freshly-initialized running stats:
#   y = (x - 0) / sqrt(1 + eps)   -> folded into the FiLM gamma outside the kernel.
BN_INV_STD = float(1.0 / np.sqrt(1.0 + BN_EPS))


# --------------------------- fused whole-network kernel ---------------------------

def _fused_tcn_kernel(*refs, block_meta, K):
    """One grid step = one batch element; all TCN blocks + output head fused.

    refs layout (inputs, then output):
      refs[0]                           : x     (1, Cin0, Tin)
      refs[1]                           : film  (1, sum_n 2*Cout_n, 1)  [gamma_n; beta_n] stacked
      refs[2+3n .. 4+3n] for block n    : w1 (Cout, K*Cin), wres (Cout, 1), alpha (Cout, 1)
      refs[2+3B] / refs[3+3B]           : out_w (nout, Cout) / out_b (nout, 1)
      refs[4+3B]                        : y_out (1, nout, Tfinal)

    All intermediate activations and the skip accumulator stay as traced f32 values
    (vregs / VMEM) across the unrolled block loop — nothing touches HBM between blocks.
    """
    nblocks = len(block_meta)
    x_ref = refs[0]
    film_ref = refs[1]
    ow_ref = refs[2 + 3 * nblocks]
    ob_ref = refs[3 + 3 * nblocks]
    o_ref = refs[4 + 3 * nblocks]

    x = x_ref[0].astype(jnp.float32)                  # [Cin0, Tin]
    film = film_ref[0].astype(jnp.float32)            # [sum 2*Cout, 1]
    skip = None
    f_off = 0                                          # static Python offset into film

    for n, (cin, cout, dil, tin, tout) in enumerate(block_meta):
        w1_ref = refs[2 + 3 * n]
        wres_ref = refs[3 + 3 * n]
        a_ref = refs[4 + 3 * n]
        w1 = w1_ref[...].astype(jnp.float32)           # [Cout, K*Cin]

        gamma = film[f_off: f_off + cout, :]           # [Cout, 1]  (BN scale folded in)
        beta = film[f_off + cout: f_off + 2 * cout, :]  # [Cout, 1]
        f_off += 2 * cout

        if cin == 1:
            # Block 0 (rank-1 taps): pure VPU broadcast multiply-accumulate,
            # avoids a degenerate [Cout,1]x[1,T] MXU push per tap.
            acc = w1[:, 0:1] * x[:, 0:tout]
            for k in range(1, K):
                acc = acc + w1[:, k:k + 1] * x[:, k * dil: k * dil + tout]
        else:
            # Stack the K dilated windows -> single contraction-(K*Cin) MXU matmul.
            xk = jnp.concatenate(
                [x[:, k * dil: k * dil + tout] for k in range(K)], axis=0)
            acc = jnp.dot(w1, xk, preferred_element_type=jnp.float32)

        # BatchNorm (eval, affine=False) folded into gamma; then FiLM + PReLU.
        acc = acc * gamma + beta
        acc = jnp.where(acc > 0, acc, acc * a_ref[...])   # PReLU (per-channel alpha)

        # Residual Conv1d(in_ch, out_ch, k=1, groups=in_ch, bias=False):
        # broadcast (in_ch==1) or depthwise scale (in_ch==out_ch), on the cropped input.
        crop_x = (tin - tout) // 2
        xo = acc + wres_ref[...] * x[:, crop_x: crop_x + tout]

        # skips = center_crop(skips, Tout) + x   (block 0: skips = x). f32 accumulation.
        if skip is None:
            skip = xo
        else:
            crop_s = (skip.shape[-1] - tout) // 2
            skip = skip[:, crop_s: crop_s + tout] + xo
        x = xo

    # Output head: tanh(Conv1d(out_ch -> noutputs, k=1, bias=True)(x + skips)).
    z = x + skip
    y = jnp.dot(ow_ref[...].astype(jnp.float32), z,
                preferred_element_type=jnp.float32) + ob_ref[...]
    o_ref[0] = jnp.tanh(y).astype(o_ref.dtype)


def tcn_fused_forward(x, block_params, film, out_w, out_b, *, kernel_size):
    """x: [B, Cin0, T] f32;  film: [B, sum(2*Cout), 1] packed per-batch FiLM params."""
    B, cin0, T = x.shape
    nout = out_w.shape[0]
    total_fb = film.shape[1]

    args = [x, film]
    in_specs = [
        pl.BlockSpec((1, cin0, T), lambda b: (b, 0, 0)),
        pl.BlockSpec((1, total_fb, 1), lambda b: (b, 0, 0)),
    ]
    block_meta = []

    tin, cin = T, cin0
    for blk in block_params:
        cout = blk["w1"].shape[0]
        dil = blk["dil"]
        tout = tin - (kernel_size - 1) * dil
        block_meta.append((cin, cout, dil, tin, tout))

        args += [blk["w1"], blk["wres"], blk["alpha"]]
        in_specs += [
            pl.BlockSpec(blk["w1"].shape, lambda b: (0, 0)),     # conv weight [Cout, K*Cin]
            pl.BlockSpec(blk["wres"].shape, lambda b: (0, 0)),   # residual weight [Cout, 1]
            pl.BlockSpec(blk["alpha"].shape, lambda b: (0, 0)),  # PReLU alpha [Cout, 1]
        ]
        tin, cin = tout, cout

    t_final = tin
    args += [out_w, out_b]
    in_specs += [pl.BlockSpec(out_w.shape, lambda b: (0, 0)),
                 pl.BlockSpec(out_b.shape, lambda b: (0, 0))]

    kernel = functools.partial(_fused_tcn_kernel,
                               block_meta=tuple(block_meta), K=kernel_size)

    return pl.pallas_call(
        kernel,
        out_shape=jax.ShapeDtypeStruct((B, nout, t_final), x.dtype),
        grid=(B,),
        in_specs=in_specs,
        out_specs=pl.BlockSpec((1, nout, t_final), lambda b: (b, 0, 0)),
        compiler_params=pltpu.CompilerParams(
            dimension_semantics=("parallel",)),   # v7x: two TensorCores split the batch
    )(*args)


# ------------------------------- params & forward ------------------------------

def _linear_params(key, din, dout, scale=0.1):
    kw, kb = jax.random.split(key)
    return (scale * jax.random.normal(kw, (dout, din), jnp.float32),
            scale * jax.random.normal(kb, (dout,), jnp.float32))


def init_params(key, nparams, ninputs, noutputs, nblocks, kernel_size,
                dilation_growth, channel_width, stack_size):
    keys = jax.random.split(key, 5 + nblocks)
    params = {}
    # conditioning generator: Linear(nparams,16)->ReLU->Linear(16,32)->ReLU->Linear(32,32)->ReLU
    params["gen"] = [_linear_params(keys[0], nparams, 16),
                     _linear_params(keys[1], 16, 32),
                     _linear_params(keys[2], 32, 32)]

    blocks = []
    in_ch = ninputs
    for n in range(nblocks):
        out_ch = channel_width                     # channel_growth == 1
        dil = dilation_growth ** (n % stack_size)
        # Residual groups=in_ch conv is only expressible as broadcast/depthwise here.
        assert in_ch == 1 or in_ch == out_ch, "residual grouped conv needs in_ch in {1, out_ch}"
        bk = jax.random.split(keys[5 + n], 3)
        w1 = 0.1 * jax.random.normal(bk[0], (out_ch, in_ch, kernel_size), jnp.float32)
        # (Cout, Cin, K) -> (Cout, K*Cin): one contraction-(K*Cin) matmul in the kernel.
        w1_mat = jnp.transpose(w1, (0, 2, 1)).reshape(out_ch, kernel_size * in_ch)
        wres = 0.1 * jax.random.normal(bk[1], (out_ch, 1), jnp.float32)   # Conv1d(k=1, groups=in_ch)
        alpha = jnp.full((out_ch, 1), 0.25, jnp.float32)                  # PReLU default init
        wa, ba = _linear_params(bk[2], 32, out_ch * 2)                    # FiLM adaptor
        blocks.append(dict(w1=w1_mat, wres=wres, alpha=alpha, wa=wa, ba=ba,
                           dil=dil, out_ch=out_ch, in_ch=in_ch))
        in_ch = out_ch
    params["blocks"] = blocks
    params["out_w"] = 0.1 * jax.random.normal(keys[3], (noutputs, channel_width), jnp.float32)
    params["out_b"] = 0.1 * jax.random.normal(keys[4], (noutputs, 1), jnp.float32)
    return params


def _film_params(params, p):
    """Conditioning MLP + per-block FiLM gamma/beta, packed to [B, sum(2*Cout), 1]."""
    cond = p                                           # [B, 1, nparams]
    for (w, b) in params["gen"]:
        cond = jax.nn.relu(cond @ w.T + b)             # -> [B, 1, 32]

    parts = []
    for blk in params["blocks"]:
        gb = cond @ blk["wa"].T + blk["ba"]            # [B, 1, 2*Cout]
        oc = blk["out_ch"]
        g = jnp.transpose(gb[..., :oc], (0, 2, 1)) * BN_INV_STD   # [B, Cout, 1] (BN folded)
        b_ = jnp.transpose(gb[..., oc:], (0, 2, 1))               # [B, Cout, 1]
        parts += [g, b_]
    return jnp.concatenate(parts, axis=1)              # [B, sum(2*Cout), 1]


def tcn_forward(params, x, p, *, kernel_size):
    film = _film_params(params, p)                     # tiny plain-JAX glue
    return tcn_fused_forward(x, params["blocks"], film,
                             params["out_w"], params["out_b"],
                             kernel_size=kernel_size)


# ------------------------- pure-JAX reference (correctness) -------------------------

def tcn_reference(params, x, p, *, kernel_size):
    cond = p
    for (w, b) in params["gen"]:
        cond = jax.nn.relu(cond @ w.T + b)

    skips = None
    for blk in params["blocks"]:
        oc, ic, dil = blk["out_ch"], blk["in_ch"], blk["dil"]
        gb = cond @ blk["wa"].T + blk["ba"]
        g = jnp.transpose(gb[..., :oc], (0, 2, 1)) * BN_INV_STD
        b_ = jnp.transpose(gb[..., oc:], (0, 2, 1))

        tin = x.shape[-1]
        tout = tin - (kernel_size - 1) * dil
        w1 = blk["w1"].reshape(oc, kernel_size, ic)     # (co, k, ci)
        acc = jnp.zeros((x.shape[0], oc, tout), jnp.float32)
        for k in range(kernel_size):
            acc = acc + jnp.einsum("oc,bct->bot", w1[:, k, :],
                                   x[:, :, k * dil: k * dil + tout])
        acc = acc * g + b_
        acc = jnp.where(acc > 0, acc, acc * blk["alpha"][None])
        crop = (tin - tout) // 2
        x = acc + blk["wres"][None] * x[:, :, crop: crop + tout]
        if skips is None:
            skips = x
        else:
            cs = (skips.shape[-1] - tout) // 2
            skips = skips[:, :, cs: cs + tout] + x

    z = x + skips
    y = jnp.einsum("oc,bct->bot", params["out_w"], z) + params["out_b"][None]
    return jnp.tanh(y)


# ------------------------------------ main --------------------------------------

if __name__ == "__main__":
    key = jax.random.PRNGKey(0)
    kp, kx, kc = jax.random.split(key, 3)

    # Small but representative TCNModel config (conditional path, nparams > 0).
    nparams, ninputs, noutputs = 2, 1, 1
    nblocks, kernel_size, dilation_growth = 3, 3, 2
    channel_width, stack_size = 32, 10
    B, T = 2, 128

    params = init_params(kp, nparams, ninputs, noutputs, nblocks, kernel_size,
                         dilation_growth, channel_width, stack_size)

    x = jax.random.normal(kx, (B, ninputs, T), jnp.float32)    # audio, NCT layout
    p = jax.random.normal(kc, (B, 1, nparams), jnp.float32)    # conditioning params

    y = tcn_forward(params, x, p, kernel_size=kernel_size)
    y = jax.block_until_ready(y)

    # receptive field = 3 + 2*2 + 2*4 = 15  ->  output length = 128 - 14 = 114
    assert y.shape == (B, noutputs, T - 14), y.shape
    assert bool(jnp.all(jnp.isfinite(y)))

    # Correctness check against a pure-JAX reference of the same (eval-mode BN) math.
    y_ref = jax.block_until_ready(tcn_reference(params, x, p, kernel_size=kernel_size))
    np.testing.assert_allclose(np.asarray(y), np.asarray(y_ref), atol=2e-3, rtol=2e-3)

    print("KERNEL_OK")
</pallas_src>

<mosaic_0001>
module attributes {stable_mosaic.version = 11 : i64} {
  func.func @_fused_tcn_kernel(%arg0: i32, %arg1: memref<1x1x128xf32, #tpu.memory_space<vmem>>, %arg2: memref<1x192x1xf32, #tpu.memory_space<vmem>>, %arg3: memref<32x3xf32, #tpu.memory_space<vmem>>, %arg4: memref<32x1xf32, #tpu.memory_space<vmem>>, %arg5: memref<32x1xf32, #tpu.memory_space<vmem>>, %arg6: memref<32x96xf32, #tpu.memory_space<vmem>>, %arg7: memref<32x1xf32, #tpu.memory_space<vmem>>, %arg8: memref<32x1xf32, #tpu.memory_space<vmem>>, %arg9: memref<32x96xf32, #tpu.memory_space<vmem>>, %arg10: memref<32x1xf32, #tpu.memory_space<vmem>>, %arg11: memref<32x1xf32, #tpu.memory_space<vmem>>, %arg12: memref<1x32xf32, #tpu.memory_space<vmem>>, %arg13: memref<1x1xf32, #tpu.memory_space<vmem>>, %arg14: memref<1x1x114xf32, #tpu.memory_space<vmem>>) attributes {dimension_semantics = [#tpu.dimension_semantics<parallel>], iteration_bounds = array<i64: 2>, scalar_prefetch = 0 : i64, scratch_operands = 0 : i64, tpu.core_type = #tpu.core_type<tc>, window_params = [{transform_indices = @transform_0, window_bounds = array<i64: 1, 1, 128>}, {transform_indices = @transform_1, window_bounds = array<i64: 1, 192, 1>}, {pipeline_mode = #tpu.pipeline_mode<synchronous>, transform_indices = @transform_2, window_bounds = array<i64: 32, 3>}, {pipeline_mode = #tpu.pipeline_mode<synchronous>, transform_indices = @transform_3, window_bounds = array<i64: 32, 1>}, {pipeline_mode = #tpu.pipeline_mode<synchronous>, transform_indices = @transform_4, window_bounds = array<i64: 32, 1>}, {pipeline_mode = #tpu.pipeline_mode<synchronous>, transform_indices = @transform_5, window_bounds = array<i64: 32, 96>}, {pipeline_mode = #tpu.pipeline_mode<synchronous>, transform_indices = @transform_6, window_bounds = array<i64: 32, 1>}, {pipeline_mode = #tpu.pipeline_mode<synchronous>, transform_indices = @transform_7, window_bounds = array<i64: 32, 1>}, {pipeline_mode = #tpu.pipeline_mode<synchronous>, transform_indices = @transform_8, window_bounds = array<i64: 32, 96>}, {pipeline_mode = #tpu.pipeline_mode<synchronous>, transform_indices = @transform_9, window_bounds = array<i64: 32, 1>}, {pipeline_mode = #tpu.pipeline_mode<synchronous>, transform_indices = @transform_10, window_bounds = array<i64: 32, 1>}, {pipeline_mode = #tpu.pipeline_mode<synchronous>, transform_indices = @transform_11, window_bounds = array<i64: 1, 32>}, {pipeline_mode = #tpu.pipeline_mode<synchronous>, transform_indices = @transform_12, window_bounds = array<i64: 1, 1>}, {transform_indices = @transform_13, window_bounds = array<i64: 1, 1, 114>}]} {
    %c0 = arith.constant 0 : index
    %c0_0 = arith.constant 0 : index
    %c0_1 = arith.constant 0 : index
    %0 = vector.load %arg1[%c0, %c0_0, %c0_1] : memref<1x1x128xf32, #tpu.memory_space<vmem>>, vector<1x1x128xf32>
    %1 = vector.shape_cast %0 : vector<1x1x128xf32> to vector<1x128xf32>
    %c0_2 = arith.constant 0 : index
    %c0_3 = arith.constant 0 : index
    %c0_4 = arith.constant 0 : index
    %2 = vector.load %arg2[%c0_2, %c0_3, %c0_4] : memref<1x192x1xf32, #tpu.memory_space<vmem>>, vector<1x192x1xf32>
    %3 = vector.shape_cast %2 : vector<1x192x1xf32> to vector<192x1xf32>
    %c0_5 = arith.constant 0 : index
    %c0_6 = arith.constant 0 : index
    %4 = vector.load %arg3[%c0_5, %c0_6] : memref<32x3xf32, #tpu.memory_space<vmem>>, vector<32x3xf32>
    %5 = vector.extract_strided_slice %3 {offsets = [0, 0], sizes = [32, 1], strides = [1, 1]} : vector<192x1xf32> to vector<32x1xf32>
    %6 = vector.extract_strided_slice %3 {offsets = [32, 0], sizes = [32, 1], strides = [1, 1]} : vector<192x1xf32> to vector<32x1xf32>
    %7 = vector.extract_strided_slice %4 {offsets = [0, 0], sizes = [32, 1], strides = [1, 1]} : vector<32x3xf32> to vector<32x1xf32>
    %8 = vector.extract_strided_slice %1 {offsets = [0, 0], sizes = [1, 126], strides = [1, 1]} : vector<1x128xf32> to vector<1x126xf32>
    %9 = vector.broadcast %7 : vector<32x1xf32> to vector<32x126xf32>
    %10 = vector.broadcast %8 : vector<1x126xf32> to vector<32x126xf32>
    %11 = arith.mulf %9, %10 : vector<32x126xf32>
    %12 = vector.extract_strided_slice %4 {offsets = [0, 1], sizes = [32, 1], strides = [1, 1]} : vector<32x3xf32> to vector<32x1xf32>
    %13 = vector.extract_strided_slice %1 {offsets = [0, 1], sizes = [1, 126], strides = [1, 1]} : vector<1x128xf32> to vector<1x126xf32>
    %14 = vector.broadcast %12 : vector<32x1xf32> to vector<32x126xf32>
    %15 = vector.broadcast %13 : vector<1x126xf32> to vector<32x126xf32>
    %16 = arith.mulf %14, %15 : vector<32x126xf32>
    %17 = arith.addf %11, %16 : vector<32x126xf32>
    %18 = vector.extract_strided_slice %4 {offsets = [0, 2], sizes = [32, 1], strides = [1, 1]} : vector<32x3xf32> to vector<32x1xf32>
    %19 = vector.extract_strided_slice %1 {offsets = [0, 2], sizes = [1, 126], strides = [1, 1]} : vector<1x128xf32> to vector<1x126xf32>
    %20 = vector.broadcast %18 : vector<32x1xf32> to vector<32x126xf32>
    %21 = vector.broadcast %19 : vector<1x126xf32> to vector<32x126xf32>
    %22 = arith.mulf %20, %21 : vector<32x126xf32>
    %23 = arith.addf %17, %22 : vector<32x126xf32>
    %24 = vector.broadcast %5 : vector<32x1xf32> to vector<32x126xf32>
    %25 = arith.mulf %23, %24 : vector<32x126xf32>
    %26 = vector.broadcast %6 : vector<32x1xf32> to vector<32x126xf32>
    %27 = arith.addf %25, %26 : vector<32x126xf32>
    %cst = arith.constant 0.000000e+00 : f32
    %28 = vector.broadcast %cst : f32 to vector<32x126xf32>
    %29 = arith.cmpf ogt, %27, %28 : vector<32x126xf32>
    %c0_7 = arith.constant 0 : index
    %c0_8 = arith.constant 0 : index
    %30 = vector.load %arg5[%c0_7, %c0_8] : memref<32x1xf32, #tpu.memory_space<vmem>>, vector<32x1xf32>
    %31 = vector.broadcast %30 : vector<32x1xf32> to vector<32x126xf32>
    %32 = arith.mulf %27, %31 : vector<32x126xf32>
    %33 = arith.select %29, %27, %32 : vector<32x126xi1>, vector<32x126xf32>
    %c0_9 = arith.constant 0 : index
    %c0_10 = arith.constant 0 : index
    %34 = vector.load %arg4[%c0_9, %c0_10] : memref<32x1xf32, #tpu.memory_space<vmem>>, vector<32x1xf32>
    %35 = vector.extract_strided_slice %1 {offsets = [0, 1], sizes = [1, 126], strides = [1, 1]} : vector<1x128xf32> to vector<1x126xf32>
    %36 = vector.broadcast %34 : vector<32x1xf32> to vector<32x126xf32>
    %37 = vector.broadcast %35 : vector<1x126xf32> to vector<32x126xf32>
    %38 = arith.mulf %36, %37 : vector<32x126xf32>
    %39 = arith.addf %33, %38 : vector<32x126xf32>
    %c0_11 = arith.constant 0 : index
    %c0_12 = arith.constant 0 : index
    %40 = vector.load %arg6[%c0_11, %c0_12] : memref<32x96xf32, #tpu.memory_space<vmem>>, vector<32x96xf32>
    %41 = vector.extract_strided_slice %3 {offsets = [64, 0], sizes = [32, 1], strides = [1, 1]} : vector<192x1xf32> to vector<32x1xf32>
    %42 = vector.extract_strided_slice %3 {offsets = [96, 0], sizes = [32, 1], strides = [1, 1]} : vector<192x1xf32> to vector<32x1xf32>
    %43 = vector.extract_strided_slice %39 {offsets = [0, 0], sizes = [32, 122], strides = [1, 1]} : vector<32x126xf32> to vector<32x122xf32>
    %44 = vector.extract_strided_slice %39 {offsets = [0, 2], sizes = [32, 122], strides = [1, 1]} : vector<32x126xf32> to vector<32x122xf32>
    %45 = vector.extract_strided_slice %39 {offsets = [0, 4], sizes = [32, 122], strides = [1, 1]} : vector<32x126xf32> to vector<32x122xf32>
    %46 = tpu.concatenate %43, %44, %45 in 0 : vector<32x122xf32>, vector<32x122xf32>, vector<32x122xf32> -> vector<96x122xf32>
    %cst_13 = arith.constant dense<0.000000e+00> : vector<32x122xf32>
    %47 = tpu.matmul %40, %46, %cst_13 {dimension_numbers = #tpu.dot_dimension_numbers<[1], [0], [0], [1], [0, 0, 1, 1], [], []>} : vector<32x96xf32>, vector<96x122xf32>, vector<32x122xf32> -> vector<32x122xf32>
    %48 = vector.broadcast %41 : vector<32x1xf32> to vector<32x122xf32>
    %49 = arith.mulf %47, %48 : vector<32x122xf32>
    %50 = vector.broadcast %42 : vector<32x1xf32> to vector<32x122xf32>
    %51 = arith.addf %49, %50 : vector<32x122xf32>
    %cst_14 = arith.constant 0.000000e+00 : f32
    %52 = vector.broadcast %cst_14 : f32 to vector<32x122xf32>
    %53 = arith.cmpf ogt, %51, %52 : vector<32x122xf32>
    %c0_15 = arith.constant 0 : index
    %c0_16 = arith.constant 0 : index
    %54 = vector.load %arg8[%c0_15, %c0_16] : memref<32x1xf32, #tpu.memory_space<vmem>>, vector<32x1xf32>
    %55 = vector.broadcast %54 : vector<32x1xf32> to vector<32x122xf32>
    %56 = arith.mulf %51, %55 : vector<32x122xf32>
    %57 = arith.select %53, %51, %56 : vector<32x122xi1>, vector<32x122xf32>
    %c0_17 = arith.constant 0 : index
    %c0_18 = arith.constant 0 : index
    %58 = vector.load %arg7[%c0_17, %c0_18] : memref<32x1xf32, #tpu.memory_space<vmem>>, vector<32x1xf32>
    %59 = vector.extract_strided_slice %39 {offsets = [0, 2], sizes = [32, 122], strides = [1, 1]} : vector<32x126xf32> to vector<32x122xf32>
    %60 = vector.broadcast %58 : vector<32x1xf32> to vector<32x122xf32>
    %61 = arith.mulf %60, %59 : vector<32x122xf32>
    %62 = arith.addf %57, %61 : vector<32x122xf32>
    %63 = vector.extract_strided_slice %39 {offsets = [0, 2], sizes = [32, 122], strides = [1, 1]} : vector<32x126xf32> to vector<32x122xf32>
    %64 = arith.addf %63, %62 : vector<32x122xf32>
    %c0_19 = arith.constant 0 : index
    %c0_20 = arith.constant 0 : index
    %65 = vector.load %arg9[%c0_19, %c0_20] : memref<32x96xf32, #tpu.memory_space<vmem>>, vector<32x96xf32>
    %66 = vector.extract_strided_slice %3 {offsets = [128, 0], sizes = [32, 1], strides = [1, 1]} : vector<192x1xf32> to vector<32x1xf32>
    %67 = vector.extract_strided_slice %3 {offsets = [160, 0], sizes = [32, 1], strides = [1, 1]} : vector<192x1xf32> to vector<32x1xf32>
    %68 = vector.extract_strided_slice %62 {offsets = [0, 0], sizes = [32, 114], strides = [1, 1]} : vector<32x122xf32> to vector<32x114xf32>
    %69 = vector.extract_strided_slice %62 {offsets = [0, 4], sizes = [32, 114], strides = [1, 1]} : vector<32x122xf32> to vector<32x114xf32>
    %70 = vector.extract_strided_slice %62 {offsets = [0, 8], sizes = [32, 114], strides = [1, 1]} : vector<32x122xf32> to vector<32x114xf32>
    %71 = tpu.concatenate %68, %69, %70 in 0 : vector<32x114xf32>, vector<32x114xf32>, vector<32x114xf32> -> vector<96x114xf32>
    %cst_21 = arith.constant dense<0.000000e+00> : vector<32x114xf32>
    %72 = tpu.matmul %65, %71, %cst_21 {dimension_numbers = #tpu.dot_dimension_numbers<[1], [0], [0], [1], [0, 0, 1, 1], [], []>} : vector<32x96xf32>, vector<96x114xf32>, vector<32x114xf32> -> vector<32x114xf32>
    %73 = vector.broadcast %66 : vector<32x1xf32> to vector<32x114xf32>
    %74 = arith.mulf %72, %73 : vector<32x114xf32>
    %75 = vector.broadcast %67 : vector<32x1xf32> to vector<32x114xf32>
    %76 = arith.addf %74, %75 : vector<32x114xf32>
    %cst_22 = arith.constant 0.000000e+00 : f32
    %77 = vector.broadcast %cst_22 : f32 to vector<32x114xf32>
    %78 = arith.cmpf ogt, %76, %77 : vector<32x114xf32>
    %c0_23 = arith.constant 0 : index
    %c0_24 = arith.constant 0 : index
    %79 = vector.load %arg11[%c0_23, %c0_24] : memref<32x1xf32, #tpu.memory_space<vmem>>, vector<32x1xf32>
    %80 = vector.broadcast %79 : vector<32x1xf32> to vector<32x114xf32>
    %81 = arith.mulf %76, %80 : vector<32x114xf32>
    %82 = arith.select %78, %76, %81 : vector<32x114xi1>, vector<32x114xf32>
    %c0_25 = arith.constant 0 : index
    %c0_26 = arith.constant 0 : index
    %83 = vector.load %arg10[%c0_25, %c0_26] : memref<32x1xf32, #tpu.memory_space<vmem>>, vector<32x1xf32>
    %84 = vector.extract_strided_slice %62 {offsets = [0, 4], sizes = [32, 114], strides = [1, 1]} : vector<32x122xf32> to vector<32x114xf32>
    %85 = vector.broadcast %83 : vector<32x1xf32> to vector<32x114xf32>
    %86 = arith.mulf %85, %84 : vector<32x114xf32>
    %87 = arith.addf %82, %86 : vector<32x114xf32>
    %88 = vector.extract_strided_slice %64 {offsets = [0, 4], sizes = [32, 114], strides = [1, 1]} : vector<32x122xf32> to vector<32x114xf32>
    %89 = arith.addf %88, %87 : vector<32x114xf32>
    %90 = arith.addf %87, %89 : vector<32x114xf32>
    %c0_27 = arith.constant 0 : index
    %c0_28 = arith.constant 0 : index
    %91 = vector.load %arg12[%c0_27, %c0_28] : memref<1x32xf32, #tpu.memory_space<vmem>>, vector<1x32xf32>
    %cst_29 = arith.constant dense<0.000000e+00> : vector<1x114xf32>
    %92 = tpu.matmul %91, %90, %cst_29 {dimension_numbers = #tpu.dot_dimension_numbers<[1], [0], [0], [1], [0, 0, 1, 1], [], []>} : vector<1x32xf32>, vector<32x114xf32>, vector<1x114xf32> -> vector<1x114xf32>
    %c0_30 = arith.constant 0 : index
    %c0_31 = arith.constant 0 : index
    %93 = vector.load %arg13[%c0_30, %c0_31] : memref<1x1xf32, #tpu.memory_space<vmem>>, vector<1x1xf32>
    %94 = vector.broadcast %93 : vector<1x1xf32> to vector<1x114xf32>
    %95 = arith.addf %92, %94 : vector<1x114xf32>
    %96 = math.tanh %95 : vector<1x114xf32>
    %c0_32 = arith.constant 0 : index
    %c0_33 = arith.constant 0 : index
    %c0_34 = arith.constant 0 : index
    %97 = vector.load %arg14[%c0_32, %c0_33, %c0_34] : memref<1x1x114xf32, #tpu.memory_space<vmem>>, vector<1x1x114xf32>
    %98 = vector.shape_cast %97 : vector<1x1x114xf32> to vector<1x114xf32>
    %99 = vector.shape_cast %96 : vector<1x114xf32> to vector<1x1x114xf32>
    tpu.vector_store %arg14[%c0_32, %c0_33, %c0_34], %99 {strides = array<i32>} : memref<1x1x114xf32, #tpu.memory_space<vmem>>, vector<1x1x114xf32>,
    return
  }
  func.func @transform_0(%arg0: i32) -> (i32, i32, i32) {
    %c0_i32 = arith.constant 0 : i32
    %c0_i32_0 = arith.constant 0 : i32
    %c0_i32_1 = arith.constant 0 : i32
    return %arg0, %c0_i32, %c0_i32_0 : i32, i32, i32
  }
  func.func @transform_1(%arg0: i32) -> (i32, i32, i32) {
    %c0_i32 = arith.constant 0 : i32
    %c0_i32_0 = arith.constant 0 : i32
    %c0_i32_1 = arith.constant 0 : i32
    return %arg0, %c0_i32, %c0_i32_0 : i32, i32, i32
  }
  func.func @transform_2(%arg0: i32) -> (i32, i32) {
    %c0_i32 = arith.constant 0 : i32
    %c0_i32_0 = arith.constant 0 : i32
    %c0_i32_1 = arith.constant 0 : i32
    return %c0_i32, %c0_i32_0 : i32, i32
  }
  func.func @transform_3(%arg0: i32) -> (i32, i32) {
    %c0_i32 = arith.constant 0 : i32
    %c0_i32_0 = arith.constant 0 : i32
    %c0_i32_1 = arith.constant 0 : i32
    return %c0_i32, %c0_i32_0 : i32, i32
  }
  func.func @transform_4(%arg0: i32) -> (i32, i32) {
    %c0_i32 = arith.constant 0 : i32
    %c0_i32_0 = arith.constant 0 : i32
    %c0_i32_1 = arith.constant 0 : i32
    return %c0_i32, %c0_i32_0 : i32, i32
  }
  func.func @transform_5(%arg0: i32) -> (i32, i32) {
    %c0_i32 = arith.constant 0 : i32
    %c0_i32_0 = arith.constant 0 : i32
    %c0_i32_1 = arith.constant 0 : i32
    return %c0_i32, %c0_i32_0 : i32, i32
  }
  func.func @transform_6(%arg0: i32) -> (i32, i32) {
    %c0_i32 = arith.constant 0 : i32
    %c0_i32_0 = arith.constant 0 : i32
    %c0_i32_1 = arith.constant 0 : i32
    return %c0_i32, %c0_i32_0 : i32, i32
  }
  func.func @transform_7(%arg0: i32) -> (i32, i32) {
    %c0_i32 = arith.constant 0 : i32
    %c0_i32_0 = arith.constant 0 : i32
    %c0_i32_1 = arith.constant 0 : i32
    return %c0_i32, %c0_i32_0 : i32, i32
  }
  func.func @transform_8(%arg0: i32) -> (i32, i32) {
    %c0_i32 = arith.constant 0 : i32
    %c0_i32_0 = arith.constant 0 : i32
    %c0_i32_1 = arith.constant 0 : i32
    return %c0_i32, %c0_i32_0 : i32, i32
  }
  func.func @transform_9(%arg0: i32) -> (i32, i32) {
    %c0_i32 = arith.constant 0 : i32
    %c0_i32_0 = arith.constant 0 : i32
    %c0_i32_1 = arith.constant 0 : i32
    return %c0_i32, %c0_i32_0 : i32, i32
  }
  func.func @transform_10(%arg0: i32) -> (i32, i32) {
    %c0_i32 = arith.constant 0 : i32
    %c0_i32_0 = arith.constant 0 : i32
    %c0_i32_1 = arith.constant 0 : i32
    return %c0_i32, %c0_i32_0 : i32, i32
  }
  func.func @transform_11(%arg0: i32) -> (i32, i32) {
    %c0_i32 = arith.constant 0 : i32
    %c0_i32_0 = arith.constant 0 : i32
    %c0_i32_1 = arith.constant 0 : i32
    return %c0_i32, %c0_i32_0 : i32, i32
  }
  func.func @transform_12(%arg0: i32) -> (i32, i32) {
    %c0_i32 = arith.constant 0 : i32
    %c0_i32_0 = arith.constant 0 : i32
    %c0_i32_1 = arith.constant 0 : i32
    return %c0_i32, %c0_i32_0 : i32, i32
  }
  func.func @transform_13(%arg0: i32) -> (i32, i32, i32) {
    %c0_i32 = arith.constant 0 : i32
    %c0_i32_0 = arith.constant 0 : i32
    %c0_i32_1 = arith.constant 0 : i32
    return %arg0, %c0_i32, %c0_i32_0 : i32, i32, i32
  }
}

</mosaic_0001>

<bundles_post_ra>
// kernel: tpu_custom_call.1
= control target key start
LH: loop header
LB: loop body
LE: loop exit
PB: predicated region body
PF: predicated region fallthrough
CT: control target
= control target key end

     0   :  { %s2246_s0 = inlined_call_operand.vmem [shape: f32[2,1,128], index: 0, kind: input, shape index: {}]   ;;  %s2247_s1 = inlined_call_operand.vmem [shape: f32[2,192,1], index: 1, kind: input, shape index: {}]   ;;  %s2248_s2 = inlined_call_operand.vmem [shape: f32[32,3], index: 2, kind: input, shape index: {}]   ;;  %s2249_s3 = inlined_call_operand.vmem [shape: f32[32,1], index: 3, kind: input, shape index: {}]   ;;  %s2250_s4 = inlined_call_operand.vmem [shape: f32[32,1], index: 4, kind: input, shape index: {}]   ;;  %s2251_s5 = inlined_call_operand.vmem [shape: f32[32,96], index: 5, kind: input, shape index: {}]   ;;  %s2252_s6 = inlined_call_operand.vmem [shape: f32[32,1], index: 6, kind: input, shape index: {}]   ;;  %s2253_s7 = inlined_call_operand.vmem [shape: f32[32,1], index: 7, kind: input, shape index: {}]   ;;  %s2254_s8 = inlined_call_operand.vmem [shape: f32[32,96], index: 8, kind: input, shape index: {}]   ;;  %s2255_s9 = inlined_call_operand.vmem [shape: f32[32,1], index: 9, kind: input, shape index: {}]   ;;  %s2256_s10 = inlined_call_operand.vmem [shape: f32[32,1], index: 10, kind: input, shape index: {}]   ;;  %s2257_s11 = inlined_call_operand.vmem [shape: f32[1,32], index: 11, kind: input, shape index: {}]   ;;  %s2258_s12 = inlined_call_operand.<no memory space> [shape: f32[1,1], index: 12, kind: input, shape index: {}]   ;;  %s2259_s13 = inlined_call_operand.hbm [shape: f32[2,1,114], index: 13, kind: output, shape index: {}]  }
   0x1   :  { %2260 = sst [smem:[#allocation6_spill]] %s2247_s1  ;;  %v18_v0 = vstv %s2258_s12 }
   0x2   :  { %2261 = sst [smem:[#allocation7_spill]] %s2248_s2  ;;  %19 = vst [vmem:[#allocation2] sm:$0x1] %v18_v0 }
   0x3   :  { %20 = vsyncpa [#allocation4], 0 }
   0x4   :  { %22 = vsyncpa [#allocation4 + $0x1], 0  ;;  %s1902_s27 = smov 0   ;;  %s1904_s28 = smov 0  }
   0x5   :  { %s1906_s29 = smov 0   ;;  %s1908_s30 = smov 0  }
   0x6 LB: > { %s1923_s12 = sadd.s32 4294967295, %s1813_s30   ;;  %s1469_s14 = sadd.s32 4294967294, %s1813_s30   ;;  %s1813_s30 = sphi %s1908_s30, %s2269_s30   ;;  %s1809_s29 = sphi %s1906_s29, %s2268_s29   ;;  %s1805_s28 = sphi %s1904_s28, %s2267_s28   ;;  %s1801_s27 = sphi %s1902_s27, %s2266_s27  }
   0x7   : > { %s1927_s15 = sadd.s32 1, %s1813_s30   ;;  %s318_s16 = sadd.s32 1, %s1809_s29 }
   0x8   : > { %s315_s17 = ssub.s32 %s1813_s30, %s1927_s15  ;;  %p328_p0 = scmp.ne.s32.totalorder %s1809_s29, %s1805_s28 }
   0x9   : > { %p316_p1 = scmp.eq.s32.totalorder %s315_s17, 0  ;;  %p329_p2 = scmp.eq.s32.totalorder %s1923_s12, 1 }
   0xa   : > { %p334_p3 = scmp.ne.s32.totalorder %s1805_s28, %s1801_s27  ;;  %p335_p4 = scmp.eq.s32.totalorder %s1469_s14, 1 }
   0xb   : > { %s1938_s18 = scalar_select %p316_p1, %s1809_s29, %s318_s16  }
   0xc   : > { %p1940_p5 = por %p329_p2, %p328_p0  ;;  %p1944_p6 = por %p335_p4, %p334_p3 }
   0xd   : > { %p1472_p7 = scmp.ge.s32.totalorder %s1813_s30, 1  ;;  %p400_p8 = scmp.lt.s32.totalorder %s1813_s30, 3 }
   0xf   : > { %p401_p9 = pnand %p1472_p7, %p400_p8 }
  0x10   : > { %s2264_s2 = sld [smem:[#allocation7_spill]] (!%p401_p9)  ;;  %v1815_v2 = vmov (!%p401_p9), 2   ;;  %v1816_v3 = vmov (!%p401_p9), 1   ;;  %p446_p10 = scmp.lt.s32.totalorder (!%p401_p9), %s1923_s12, 1  ;;  %v678_v7 = vld [vmem:[%s2249_s3 + $0x8] sm:$0xff] (!%p401_p9)  ;;  %v677_v8 = vld [vmem:[%s2249_s3] sm:$0xff] (!%p401_p9) }
  0x11   : > { %404 = sbr.rel (%p401_p9) target bundleno = 1493 (0x5d5), region = 72  ;;  %1703 = vset.pattern.permute.xlu1 (!%p401_p9), %v1815_v2  ;;  %1702 = vset.pattern.permute.xlu0 (!%p401_p9), %v1816_v3  ;;  %v1817_v9 = vmov (!%p401_p9), 0   ;;  %v679_v10 = vld [vmem:[%s2249_s3 + $0x10] sm:$0xff] (!%p401_p9)  ;;  %v680_v11 = vld [vmem:[%s2249_s3 + $0x18] sm:$0xff] (!%p401_p9)  ;;  %s2265_s1 = sld [smem:[#allocation6_spill]] (!%p401_p9)  ;;  %v645_v16 = vld [vmem:[%s2250_s4] sm:$0xff] (!%p401_p9) }
  0x12   : > { %v647_v20 = vld [vmem:[%s2250_s4 + $0x10] sm:$0xff] (!%p401_p9)  ;;  %v646_v21 = vld [vmem:[%s2250_s4 + $0x8] sm:$0xff] (!%p401_p9)  ;;  %v648_v23 = vld [vmem:[%s2250_s4 + $0x18] sm:$0xff] (!%p401_p9)  ;;  %s1819_s16 = smov (!%p401_p9), 126   ;;  %vm757_vm4 = vcmask (!%p401_p9), 785408   ;;  %s1822_s25 = smov (!%p401_p9), 2  }
  0x13   : > { %vm1825_vm13 = vmmov (!%p401_p9), 0   ;;  %s1827_s26 = smov (!%p401_p9), 122   ;;  %vm1315_vm14 = vcmask (!%p401_p9), 261120   ;;  %vm1390_vm15 = vcmask (!%p401_p9), 925696  }
  0x16   : > { %v479_v1 = vld [vmem:[%s2264_s2] sm:$0xff] (!%p401_p9)  ;;  %v480_v4 = vld [vmem:[%s2264_s2 + $0x8] sm:$0xff] (!%p401_p9)  ;;  %v481_v5 = vld [vmem:[%s2264_s2 + $0x10] sm:$0xff] (!%p401_p9) }
  0x17   : > { %554 = vperm.xlu1 (!%p401_p9), %1703, %v479_v1   ;;  %514 = vperm.xlu0 (!%p401_p9), %1702, %v479_v1   ;;  %v482_v6 = vld [vmem:[%s2264_s2 + $0x18] sm:$0xff] (!%p401_p9) }
  0x18   : > { %s1970_s24 = scalar_select %p446_p10, %s1923_s12, 1 }
  0x1a   : > { %s1649_s14 = smul.u32 192, %s1970_s24  ;;  %s448_s2 = scalar_lea.vmem %s2246_s0, %s1970_s24 }
  0x1b   : > { %558 = vperm.xlu1 %1703, %v480_v4   ;;  %518 = vperm.xlu0 %1702, %v480_v4   ;;  %v2008_v24 = vld [vmem:[%s448_s2] ss:$0 sm:$0xff]  ;;  %s1484_s24 = sshll.u32 %s1923_s12, 4  ;;  %s1828_s12 = smov [#allocation3]  }
  0x1c   : > { %s1982_s23 = scalar_lea.vmem %s2265_s1, %s1649_s14  ;;  %s1818_s14 = smov 127  }
  0x1d   : > { %v455_v12 = vld [vmem:[%s1982_s23] sm:$0xff]  ;;  %v457_v14 = vld [vmem:[%s1982_s23 + $0x10] sm:$0xff]  ;;  %v456_v15 = vld [vmem:[%s1982_s23 + $0x8] sm:$0xff]  ;;  %s1820_s1 = smov 124  }
  0x1e   : > { %v459_v13 = vld [vmem:[%s1982_s23 + $0x20] sm:$0xff]  ;;  %v460_v17 = vld [vmem:[%s1982_s23 + $0x28] sm:$0xff]  ;;  %v461_v18 = vld [vmem:[%s1982_s23 + $0x30] sm:$0xff] }
  0x1f   : > { %1704 = vset.pattern.permute.xlu1 %v1816_v3  ;;  %522 = vperm.xlu0 %1702, %v481_v5   ;;  %v458_v19 = vld [vmem:[%s1982_s23 + $0x18] sm:$0xff] }
  0x20   : > { %526 = vperm.xlu1 %1704, %v482_v6   ;;  %v462_v22 = vld [vmem:[%s1982_s23 + $0x38] sm:$0xff] }
  0x23   : > { %1705 = vset.pattern.permute.xlu0 %v1815_v2 }
  0x24   : > { %1706 = vset.pattern.permute.xlu1 %v1815_v2  ;;  %562 = vperm.xlu0 %1705, %v481_v5  }
  0x25   : > { %566 = vperm.xlu1 %1706, %v482_v6  }
  0x28   : > { %1708 = vset.pattern.permute.xlu0 %v1817_v9 }
  0x29   : > { %1707 = vset.pattern.permute.xlu1 %v1817_v9  ;;  %688 = vperm.xlu0 %1708, %v678_v7  }
  0x2a   : > { %683 = vperm.xlu1 %1707, %v677_v8  }
  0x2d   : > { %485 = vperm.xlu0 %1708, %v479_v1  }
  0x2e   : > { %693 = vperm.xlu1 %1707, %v679_v10  }
  0x31   : > { %495 = vperm.xlu0 %1708, %v481_v5  }
  0x32   : > { %698 = vperm.xlu1 %1707, %v680_v11  }
  0x35   : > { %595 = vperm.xlu0 %1708, %v455_v12  }
  0x36   : > { %490 = vperm.xlu1 %1707, %v480_v4  }
  0x39   : > { %619 = vperm.xlu0 %1708, %v459_v13  }
  0x3a   : > { %500 = vperm.xlu1 %1707, %v482_v6  }
  0x3d   : > { %605 = vperm.xlu0 %1708, %v457_v14  }
  0x3e   : > { %600 = vperm.xlu1 %1707, %v456_v15  }
  0x41   : > { %651 = vperm.xlu0 %1708, %v645_v16  }
  0x42   : > { %624 = vperm.xlu1 %1707, %v460_v17  }
  0x45   : > { %629 = vperm.xlu0 %1708, %v461_v18  }
  0x46   : > { %610 = vperm.xlu1 %1707, %v458_v19  }
  0x49   : > { %661 = vperm.xlu0 %1708, %v647_v20  }
  0x4a   : > { %656 = vperm.xlu1 %1707, %v646_v21  }
  0x4e   : > { %634 = vperm.xlu1 %1707, %v462_v22  }
  0x52   : > { %666 = vperm.xlu1 %1707, %v648_v23  }
  0x96   : > { %v555_v25 = vpop.permute.xlu1 %554  ;;  %v515_v26 = vpop.permute.xlu0 %514 }
  0x97   : > { %v529_v27 = vmul.f32 %v2008_v24, %v515_v26  ;;  %v569_v30 = vmul.f32 %v2008_v24, %v555_v25 }
  0x99   : > { %537 = vrot.lane.b32.xlu0 %v529_v27, %s1818_s14 }
  0x9a   : > { %v559_v28 = vpop.permute.xlu1 %558  ;;  %v519_v29 = vpop.permute.xlu0 %518 }
  0x9b   : > { %v530_v31 = vmul.f32 %v2008_v24, %v519_v29  ;;  %v570_v33 = vmul.f32 %v2008_v24, %v559_v28 }
  0x9d   : > { %539 = vrot.lane.b32.xlu1 %v530_v31, %s1818_s14  ;;  %577 = vrot.lane.b32.xlu0 %v569_v30, %s1819_s16 }
  0x9e   : > { %v523_v32 = vpop.permute.xlu0 %522 }
  0x9f   : > { %v531_v34 = vmul.f32 %v2008_v24, %v523_v32  ;;  %v527_v35 = vpop.permute.xlu1 %526 }
  0xa0   : > { %v532_v36 = vmul.f32 %v2008_v24, %v527_v35 }
  0xa1   : > { %579 = vrot.lane.b32.xlu1 %v570_v33, %s1819_s16  ;;  %541 = vrot.lane.b32.xlu0 %v531_v34, %s1818_s14 }
  0xa3   : > { %v563_v37 = vpop.permute.xlu0 %562 }
  0xa4   : > { %v571_v38 = vmul.f32 %v2008_v24, %v563_v37  ;;  %v567_v39 = vpop.permute.xlu1 %566 }
  0xa5   : > { %543 = vrot.lane.b32.xlu1 %v532_v36, %s1818_s14  ;;  %v572_v40 = vmul.f32 %v2008_v24, %v567_v39 }
  0xa6   : > { %581 = vrot.lane.b32.xlu0 %v571_v38, %s1819_s16 }
  0xa8   : > { %v689_v41 = vpop.permute.xlu0 %688 }
  0xa9   : > { %v702_v42 = vmul.f32 %v2008_v24, %v689_v41  ;;  %v684_v43 = vpop.permute.xlu1 %683  ;;  %583 = vrot.lane.b32.xlu1 %v572_v40, %s1819_s16 }
  0xaa   : > { %v701_v44 = vmul.f32 %v2008_v24, %v684_v43 }
  0xac   : > { %709 = vrot.lane.b32.xlu0 %v701_v44, %s1818_s14  ;;  %v486_v49 = vpop.permute.xlu0 %485 }
  0xad   : > { %v694_v45 = vpop.permute.xlu1 %693  ;;  %711 = vrot.lane.b32.xlu1 %v702_v42, %s1818_s14  ;;  %v509_v2 = vmul.f32 %v2008_v24, %v486_v49  ;;  %v939_v49 = vld [vmem:[%s2252_s6] sm:$0xff] }
  0xae   : > { %v703_v46 = vmul.f32 %v2008_v24, %v694_v45 }
  0xb0   : > { %713 = vrot.lane.b32.xlu0 %v703_v46, %s1818_s14  ;;  %v496_v51 = vpop.permute.xlu0 %495 }
  0xb1   : > { %v699_v47 = vpop.permute.xlu1 %698  ;;  %v511_v13 = vmul.f32 %v2008_v24, %v496_v51  ;;  %v941_v51 = vld [vmem:[%s2252_s6 + $0x10] sm:$0xff] }
  0xb2   : > { %v704_v48 = vmul.f32 %v2008_v24, %v699_v47 }
  0xb4   : > { %715 = vrot.lane.b32.xlu1 %v704_v48, %s1818_s14  ;;  %v596_v53 = vpop.permute.xlu0 %595  ;;  %s1755_s14 = sshll.u32 %s1828_s12, 4  ;;  %s1756_s14 = int_to_ptr.vmem [resolvable:$false] %s1755_s14 }
  0xb5   : > { %v491_v50 = vpop.permute.xlu1 %490  ;;  %s1757_s2 = scalar_lea.vmem %s1756_s14, 32 }
  0xb6   : > { %v510_v6 = vmul.f32 %v2008_v24, %v491_v50  ;;  %v725_v50 = vld [vmem:[%s2251_s5] sm:$0xff] }
  0xb7   : > { %1548 = vmatprep.mubr.msk.f32.mxu0 %vm757_vm4, %v725_v50 }
  0xb8   : > { %v620_v55 = vpop.permute.xlu0 %619 }
  0xb9   : > { %v501_v52 = vpop.permute.xlu1 %500 }
  0xba   : > { %v512_v18 = vmul.f32 %v2008_v24, %v501_v52  ;;  %v940_v52 = vld [vmem:[%s2252_s6 + $0x8] sm:$0xff] }
  0xbc   : > { %v606_v57 = vpop.permute.xlu0 %605 }
  0xbd   : > { %v601_v54 = vpop.permute.xlu1 %600 }
  0xc0   : > { %v652_v59 = vpop.permute.xlu0 %651 }
  0xc1   : > { %v625_v56 = vpop.permute.xlu1 %624 }
  0xc4   : > { %v630_v61 = vpop.permute.xlu0 %629 }
  0xc5   : > { %v611_v58 = vpop.permute.xlu1 %610 }
  0xc8   : > { %v662_v63 = vpop.permute.xlu0 %661 }
  0xc9   : > { %v657_v60 = vpop.permute.xlu1 %656 }
  0xcd   : > { %v635_v62 = vpop.permute.xlu1 %634 }
  0xd1   : > { %v667_v0 = vpop.permute.xlu1 %666 }
 0x10b   : > { %v538_v1 = vpop.permute.xlu0 %537 }
 0x10c   : > { %v549_v3 = vadd.f32 %v538_v1, %v509_v2  ;;  %v910_v1 = vld [vmem:[%s2253_s7 + $0x18] sm:$0xff] }
 0x10f   : > { %v540_v4 = vpop.permute.xlu1 %539  ;;  %v578_v5 = vpop.permute.xlu0 %577 }
 0x110   : > { %v589_v7 = vadd.f32 %v578_v5, %v549_v3  ;;  %v550_v8 = vadd.f32 %v540_v4, %v510_v6 }
 0x112   : > { %v613_v9 = vmul.f32 %v596_v53, %v589_v7  ;;  %v463_v53 = vld [vmem:[%s1982_s23 + $0x40] sm:$0xff] }
 0x113   : > { %v580_v10 = vpop.permute.xlu1 %579  ;;  %v542_v11 = vpop.permute.xlu0 %541 }
 0x114   : > { %v590_v12 = vadd.f32 %v580_v10, %v550_v8  ;;  %v637_v14 = vadd.f32 %v620_v55, %v613_v9  ;;  %v551_v16 = vadd.f32 %v542_v11, %v511_v13  ;;  %v467_v55 = vld [vmem:[%s1982_s23 + $0x60] sm:$0xff] }
 0x116   : > { %v614_v15 = vmul.f32 %v601_v54, %v590_v12  ;;  %v669_v23 = vmul.f32 %v652_v59, %v637_v14  ;;  %vm641_vm0 = vcmp.gt.f32.partialorder %v637_v14, 0.0  ;;  %v942_v54 = vld [vmem:[%s2252_s6 + $0x18] sm:$0xff]  ;;  %v907_v59 = vld [vmem:[%s2253_s7] sm:$0xff] }
 0x117   : > { %v544_v17 = vpop.permute.xlu1 %543 }
 0x118   : > { %v638_v19 = vadd.f32 %v625_v56, %v614_v15  ;;  %v582_v20 = vpop.permute.xlu0 %581  ;;  %v552_v22 = vadd.f32 %v544_v17, %v512_v18  ;;  %v673_v32 = vsel %vm641_vm0, %v637_v14, %v669_v23  ;;  %v464_v56 = vld [vmem:[%s1982_s23 + $0x48] sm:$0xff]  ;;  %v728_v23 = vld [vmem:[%s2251_s5 + $0x18] sm:$0xff] }
 0x119   : > { %v591_v21 = vadd.f32 %v582_v20, %v551_v16 }
 0x11a   : > { %v670_v27 = vmul.f32 %v657_v60, %v638_v19  ;;  %vm642_vm1 = vcmp.gt.f32.partialorder %v638_v19, 0.0  ;;  %v466_v60 = vld [vmem:[%s1982_s23 + $0x58] sm:$0xff] }
 0x11b   : > { %v615_v25 = vmul.f32 %v606_v57, %v591_v21  ;;  %v584_v26 = vpop.permute.xlu1 %583  ;;  %v465_v57 = vld [vmem:[%s1982_s23 + $0x50] sm:$0xff] }
 0x11c   : > { %v592_v28 = vadd.f32 %v584_v26, %v552_v22  ;;  %v674_v35 = vsel %vm642_vm1, %v638_v19, %v670_v27  ;;  %v726_v19 = vld [vmem:[%s2251_s5 + $0x8] sm:$0xff]  ;;  %v727_v21 = vld [vmem:[%s2251_s5 + $0x10] sm:$0xff] }
 0x11d   : > { %v639_v29 = vadd.f32 %v630_v61, %v615_v25  ;;  %v469_v61 = vld [vmem:[%s1982_s23 + $0x70] sm:$0xff] }
 0x11e   : > { %v616_v30 = vmul.f32 %v611_v58, %v592_v28  ;;  %v710_v31 = vpop.permute.xlu0 %709  ;;  %v468_v58 = vld [vmem:[%s1982_s23 + $0x68] sm:$0xff] }
 0x11f   : > { %v2038_v33 = vadd.f32 %v710_v31, %v673_v32  ;;  %v712_v34 = vpop.permute.xlu1 %711  ;;  %v671_v37 = vmul.f32 %v662_v63, %v639_v29  ;;  %vm643_vm2 = vcmp.gt.f32.partialorder %v639_v29, 0.0  ;;  %v909_v63 = vld [vmem:[%s2253_s7 + $0x10] sm:$0xff] }
 0x120   : > { %v640_v24 = vadd.f32 %v635_v62, %v616_v30  ;;  %v2040_v36 = vadd.f32 %v712_v34, %v674_v35  ;;  %v908_v62 = vld [vmem:[%s2253_s7 + $0x8] sm:$0xff] }
 0x121   : > { %v675_v42 = vsel %vm643_vm2, %v639_v29, %v671_v37 }
 0x122   : > { %v1709_v38 = vpack.i.bf16 %v2040_v36, %v2038_v33  ;;  %v1595_v39 = vpack.c.bf16 %v2040_v36, %v2038_v33  ;;  %v672_v40 = vmul.f32 %v667_v0, %v640_v24  ;;  %vm644_vm3 = vcmp.gt.f32.partialorder %v640_v24, 0.0  ;;  %v714_v41 = vpop.permute.xlu0 %713  ;;  %v470_v0 = vld [vmem:[%s1982_s23 + $0x78] sm:$0xff] }
 0x123   : > { %v2047_v45 = vadd.f32 %v714_v41, %v675_v42 }
 0x124   : > { %1710 = vrot.lane.b32.xlu0 %v1709_v38, %s1819_s16  ;;  %1596 = vmatprep.subr.bf16.mxu0 %v1595_v39  ;;  %v676_v44 = vsel %vm644_vm3, %v640_v24, %v672_v40 }
 0x125   : > { %1598 = vmatpush3.bf16.msra.mxu0 %v1595_v39 }
 0x126   : > { %v716_v43 = vpop.permute.xlu1 %715 }
 0x127   : > { %v2049_v46 = vadd.f32 %v716_v43, %v676_v44 }
 0x128   : > { %1720 = vrot.lane.b32.xlu0 %v1709_v38, %s1820_s1 }
 0x129   : > { %v1714_v47 = vpack.i.bf16 %v2049_v46, %v2047_v45  ;;  %v1599_v48 = vpack.c.bf16 %v2049_v46, %v2047_v45 }
 0x12b   : > { %1715 = vrot.lane.b32.xlu1 %v1714_v47, %s1819_s16  ;;  %1600 = vmatprep.subr.bf16.mxu0 %v1599_v48 }
 0x12c   : > { %945 = vperm.xlu0 %1708, %v939_v49   ;;  %1602 = vmatpush3.bf16.msra.mxu0 %v1599_v48 }
 0x12f   : > { %1725 = vrot.lane.b32.xlu1 %v1714_v47, %s1820_s1 }
 0x130   : > { %955 = vperm.xlu0 %1708, %v941_v51  }
 0x133   : > { %950 = vperm.xlu1 %1707, %v940_v52  }
 0x134   : > { %857 = vperm.xlu0 %1708, %v463_v53  }
 0x137   : > { %960 = vperm.xlu1 %1707, %v942_v54  }
 0x138   : > { %881 = vperm.xlu0 %1708, %v467_v55  }
 0x13b   : > { %862 = vperm.xlu1 %1707, %v464_v56  }
 0x13c   : > { %867 = vperm.xlu0 %1708, %v465_v57  }
 0x13f   : > { %886 = vperm.xlu1 %1707, %v468_v58  }
 0x140   : > { %913 = vperm.xlu0 %1708, %v907_v59  }
 0x143   : > { %872 = vperm.xlu1 %1707, %v466_v60  }
 0x144   : > { %891 = vperm.xlu0 %1708, %v469_v61  }
 0x147   : > { %918 = vperm.xlu1 %1707, %v908_v62  }
 0x148   : > { %923 = vperm.xlu0 %1708, %v909_v63  }
 0x14b   : > { %896 = vperm.xlu1 %1707, %v470_v0  }
 0x14f   : > { %928 = vperm.xlu1 %1707, %v910_v1  }
 0x196   : > { %v1711_v2 = vpop.permute.xlu0 %1710 }
 0x197   : > { %v1713_v3 = vunpack.i.h.bf16 %v1711_v2  ;;  %v1712_v4 = vunpack.i.l.bf16 %v1711_v2 }
 0x199   : > { %v1603_v5 = vpack.c.bf16 %v1713_v3, %v1712_v4 }
 0x19a   : > { %v1721_v6 = vpop.permute.xlu0 %1720 }
 0x19b   : > { %1604 = vmatprep.subr.bf16.mxu0 %v1603_v5  ;;  %v1723_v8 = vunpack.i.h.bf16 %v1721_v6  ;;  %v1722_v9 = vunpack.i.l.bf16 %v1721_v6 }
 0x19c   : > { %1606 = vmatpush3.bf16.msra.mxu0 %v1603_v5 }
 0x19d   : > { %v1716_v7 = vpop.permute.xlu1 %1715  ;;  %v1611_v14 = vpack.c.bf16 %v1723_v8, %v1722_v9 }
 0x19e   : > { %v1718_v10 = vunpack.i.h.bf16 %v1716_v7  ;;  %v1717_v11 = vunpack.i.l.bf16 %v1716_v7 }
 0x1a0   : > { %v1607_v12 = vpack.c.bf16 %v1718_v10, %v1717_v11 }
 0x1a1   : > { %v1726_v13 = vpop.permute.xlu1 %1725 }
 0x1a2   : > { %v1728_v15 = vunpack.i.h.bf16 %v1726_v13  ;;  %v1727_v16 = vunpack.i.l.bf16 %v1726_v13  ;;  %1608 = vmatprep.subr.bf16.mxu0 %v1607_v12  ;;  %v1007_v13 = vld [vmem:[%s2254_s8] sm:$0xff] }
 0x1a3   : > { %1610 = vmatpush3.bf16.msra.mxu0 %v1607_v12  ;;  %1578 = vmatprep.mubr.msk.f32.mxu1 %vm757_vm4, %v1007_v13 }
 0x1a4   : > { %1612 = vmatprep.subr.bf16.mxu0 %v1611_v14  ;;  %v1615_v17 = vpack.c.bf16 %v1728_v15, %v1727_v16  ;;  %v1218_v15 = vld [vmem:[%s2255_s9 + $0x10] sm:$0xff]  ;;  %v1217_v16 = vld [vmem:[%s2255_s9 + $0x8] sm:$0xff] }
 0x1a7   : > { %1614 = vmatpush3.bf16.msra.mxu0 %v1611_v14  ;;  %v1216_v14 = vld [vmem:[%s2255_s9] sm:$0xff] }
 0x1a8   : > { %1616 = vmatprep.subr.bf16.mxu0 %v1615_v17 }
 0x1ab   : > { %v946_v18 = vpop.permute.xlu0 %945  ;;  %1618 = vmatpush3.bf16.msra.mxu0 %v1615_v17  ;;  %v471_v17 = vld [vmem:[%s1982_s23 + $0x80] sm:$0xff] }
 0x1ac   : > { %v963_v20 = vmul.f32 %v946_v18, %v2038_v33  ;;  %v1219_v18 = vld [vmem:[%s2255_s9 + $0x18] sm:$0xff] }
 0x1ae   : > { %971 = vrot.lane.b32.xlu0 %v963_v20, %s1819_s16  ;;  %1549 = vmatmul.mubr.msk.f32.vlgmr.msra.gmra.mrb[0].mxu0 %vm757_vm4, %v726_v19  ;;  %v475_v19 = vld [vmem:[%s1982_s23 + $0xa0] sm:$0xff]  ;;  %v472_v20 = vld [vmem:[%s1982_s23 + $0x88] sm:$0xff] }
 0x1af   : > { %v956_v22 = vpop.permute.xlu0 %955  ;;  %1551 = vmatprep.mubr.msk.f32.mxu0 %vm757_vm4, %v727_v21  ;;  %v473_v21 = vld [vmem:[%s1982_s23 + $0x90] sm:$0xff] }
 0x1b0   : > { %v965_v25 = vmul.f32 %v956_v22, %v2047_v45  ;;  %v476_v22 = vld [vmem:[%s1982_s23 + $0xa8] sm:$0xff] }
 0x1b2   : > { %v951_v26 = vpop.permute.xlu1 %950  ;;  %975 = vrot.lane.b32.xlu0 %v965_v25, %s1819_s16  ;;  %1552 = vmatmul.mubr.msk.f32.gmra.mrb[2].mxu0 %vm757_vm4, %v728_v23  ;;  %v1184_v23 = vld [vmem:[%s2256_s10] sm:$0xff]  ;;  %v474_v25 = vld [vmem:[%s1982_s23 + $0x98] sm:$0xff] }
 0x1b3   : > { %v964_v27 = vmul.f32 %v951_v26, %v2040_v36  ;;  %v858_v31 = vpop.permute.xlu0 %857  ;;  %v477_v26 = vld [vmem:[%s1982_s23 + $0xb0] sm:$0xff] }
 0x1b5   : > { %973 = vrot.lane.b32.xlu1 %v964_v27, %s1819_s16  ;;  %v1185_v27 = vld [vmem:[%s2256_s10 + $0x8] sm:$0xff] }
 0x1b6   : > { %v961_v28 = vpop.permute.xlu1 %960 }
 0x1b7   : > { %v966_v29 = vmul.f32 %v961_v28, %v2049_v46  ;;  %v882_v34 = vpop.permute.xlu0 %881  ;;  %v1186_v28 = vld [vmem:[%s2256_s10 + $0x10] sm:$0xff] }
 0x1b9   : > { %977 = vrot.lane.b32.xlu1 %v966_v29, %s1819_s16  ;;  %s1821_s16 = smov 120   ;;  %v478_v29 = vld [vmem:[%s1982_s23 + $0xb8] sm:$0xff]  ;;  %s444_s23 = sand.u32 1, %s1805_s28  }
 0x1ba   : > { %v863_v30 = vpop.permute.xlu1 %862 }
 0x1bb   : > { %v868_v24 = vpop.permute.xlu0 %867 }
 0x1be   : > { %v887_v32 = vpop.permute.xlu1 %886 }
 0x1bf   : > { %v914_v38 = vpop.permute.xlu0 %913 }
 0x1c2   : > { %v873_v35 = vpop.permute.xlu1 %872 }
 0x1c3   : > { %v892_v40 = vpop.permute.xlu0 %891 }
 0x1c6   : > { %v919_v37 = vpop.permute.xlu1 %918 }
 0x1c7   : > { %v924_v47 = vpop.permute.xlu0 %923 }
 0x1ca   : > { %v897_v39 = vpop.permute.xlu1 %896 }
 0x1ce   : > { %v929_v42 = vpop.permute.xlu1 %928 }
 0x220   : > { %v972_v56 = vpop.permute.xlu0 %971 }
 0x224   : > { %v976_v7 = vpop.permute.xlu0 %975 }
 0x227   : > { %v974_v52 = vpop.permute.xlu1 %973 }
 0x22b   : > { %v978_v3 = vpop.permute.xlu1 %977 }
 0x281   : > { %v1550_v41 = vpop.f32.mrb[0].mxu0 }
 0x282   : > { %v876_v43 = vmul.f32 %v1550_v41, %v863_v30  ;;  %v836_v44 = vpop.f32.mrb[1].mxu0  ;;  %v1187_v30 = vld [vmem:[%s2256_s10 + $0x18] sm:$0xff] }
 0x283   : > { %v875_v48 = vmul.f32 %v858_v31, %v836_v44 }
 0x284   : > { %v900_v49 = vadd.f32 %v887_v32, %v876_v43 }
 0x285   : > { %v899_v50 = vadd.f32 %v882_v34, %v875_v48  ;;  %v1553_v51 = vpop.f32.mrb[2].mxu0 }
 0x286   : > { %vm904_vm5 = vcmp.gt.f32.partialorder %v900_v49, 0.0  ;;  %v932_v53 = vmul.f32 %v919_v37, %v900_v49  ;;  %v878_v54 = vmul.f32 %v1553_v51, %v873_v35  ;;  %v846_v55 = vpop.f32.mrb[3].mxu0  ;;  %v1009_v51 = vld [vmem:[%s2254_s8 + $0x10] sm:$0xff] }
 0x287   : > { %vm903_vm6 = vcmp.gt.f32.partialorder %v899_v50, 0.0  ;;  %v931_v57 = vmul.f32 %v914_v38, %v899_v50  ;;  %v877_v58 = vmul.f32 %v868_v24, %v846_v55 }
 0x288   : > { %v936_v59 = vsel %vm904_vm5, %v900_v49, %v932_v53  ;;  %v902_v60 = vadd.f32 %v897_v39, %v878_v54  ;;  %v1010_v54 = vld [vmem:[%s2254_s8 + $0x18] sm:$0xff] }
 0x289   : > { %v2114_v61 = vadd.f32 %v974_v52, %v936_v59  ;;  %v935_v62 = vsel %vm903_vm6, %v899_v50, %v931_v57  ;;  %v901_v63 = vadd.f32 %v892_v40, %v877_v58  ;;  %v1008_v50 = vld [vmem:[%s2254_s8 + $0x8] sm:$0xff] }
 0x28a   : > { %v2116_v0 = vadd.f32 %v972_v56, %v935_v62  ;;  %vm906_vm7 = vcmp.gt.f32.partialorder %v902_v60, 0.0  ;;  %v934_v1 = vmul.f32 %v929_v42, %v902_v60 }
 0x28b   : > { %vm905_vm8 = vcmp.gt.f32.partialorder %v901_v63, 0.0  ;;  %v933_v2 = vmul.f32 %v924_v47, %v901_v63 }
 0x28c   : > { %v938_v4 = vsel %vm906_vm7, %v902_v60, %v934_v1  ;;  %v1729_v5 = vpack.i.bf16 %v2114_v61, %v2116_v0  ;;  %v1619_v6 = vpack.c.bf16 %v2114_v61, %v2116_v0 }
 0x28d   : > { %v2122_v8 = vadd.f32 %v978_v3, %v938_v4  ;;  %v937_v9 = vsel %vm905_vm8, %v901_v63, %v933_v2 }
 0x28e   : > { %v2124_v10 = vadd.f32 %v976_v7, %v937_v9  ;;  %1730 = vrot.lane.b32.xlu0 %v1729_v5, %s1820_s1  ;;  %1620 = vmatprep.subr.bf16.mxu1 %v1619_v6 }
 0x28f   : > { %1622 = vmatpush3.bf16.msra.mxu1 %v1619_v6 }
 0x290   : > { %v1734_v11 = vpack.i.bf16 %v2122_v8, %v2124_v10  ;;  %v1623_v12 = vpack.c.bf16 %v2122_v8, %v2124_v10 }
 0x292   : > { %1740 = vrot.lane.b32.xlu0 %v1729_v5, %s1821_s16  ;;  %1735 = vrot.lane.b32.xlu1 %v1734_v11, %s1820_s1 }
 0x293   : > { %1624 = vmatprep.subr.bf16.mxu1 %v1623_v12 }
 0x294   : > { %1626 = vmatpush3.bf16.msra.mxu1 %v1623_v12 }
 0x296   : > { %1222 = vperm.xlu0 %1708, %v1216_v14   ;;  %1745 = vrot.lane.b32.xlu1 %v1734_v11, %s1821_s16  ;;  %s445_s16 = scalar_lea.vmem [#allocation3], %s444_s23 }
 0x297   : > { %s1405_s17 = sshll.u32 %s445_s16, 4  ;;  %s2206_s17 = int_to_ptr.vmem [resolvable:$true] %s1405_s17 }
 0x298   : > { %p1758_p0 = scmp.lt.s32.totalorder %s2206_s17, %s1756_s14 }
 0x29a   : > { %1232 = vperm.xlu0 %1708, %v1218_v15   ;;  %1227 = vperm.xlu1 %1707, %v1217_v16  }
 0x29e   : > { %1134 = vperm.xlu0 %1708, %v471_v17   ;;  %1237 = vperm.xlu1 %1707, %v1219_v18  }
 0x2a2   : > { %1158 = vperm.xlu0 %1708, %v475_v19   ;;  %1139 = vperm.xlu1 %1707, %v472_v20  }
 0x2a6   : > { %1144 = vperm.xlu0 %1708, %v473_v21   ;;  %1163 = vperm.xlu1 %1707, %v476_v22  }
 0x2aa   : > { %1190 = vperm.xlu0 %1708, %v1184_v23   ;;  %1149 = vperm.xlu1 %1707, %v474_v25  }
 0x2ae   : > { %1168 = vperm.xlu0 %1708, %v477_v26   ;;  %1195 = vperm.xlu1 %1707, %v1185_v27  }
 0x2b2   : > { %1200 = vperm.xlu0 %1708, %v1186_v28   ;;  %1173 = vperm.xlu1 %1707, %v478_v29  }
 0x2b6   : > { %1205 = vperm.xlu1 %1707, %v1187_v30  }
 0x300   : > { %v1731_v31 = vpop.permute.xlu0 %1730 }
 0x301   : > { %v1733_v32 = vunpack.i.h.bf16 %v1731_v31  ;;  %v1732_v34 = vunpack.i.l.bf16 %v1731_v31 }
 0x303   : > { %v1627_v35 = vpack.c.bf16 %v1733_v32, %v1732_v34 }
 0x304   : > { %v1741_v24 = vpop.permute.xlu0 %1740  ;;  %v1736_v37 = vpop.permute.xlu1 %1735 }
 0x305   : > { %v1743_v38 = vunpack.i.h.bf16 %v1741_v24  ;;  %v1742_v39 = vunpack.i.l.bf16 %v1741_v24  ;;  %v1738_v40 = vunpack.i.h.bf16 %v1736_v37  ;;  %v1737_v41 = vunpack.i.l.bf16 %v1736_v37  ;;  %1628 = vmatprep.subr.bf16.mxu1 %v1627_v35 }
 0x306   : > { %1630 = vmatpush3.bf16.msra.mxu1 %v1627_v35 }
 0x307   : > { %v1631_v42 = vpack.c.bf16 %v1738_v40, %v1737_v41  ;;  %v1635_v44 = vpack.c.bf16 %v1743_v38, %v1742_v39  ;;  %v1824_v41 = vmov 0.0|0.0  }
 0x308   : > { %v1746_v43 = vpop.permute.xlu1 %1745  ;;  %1643 = vmatprep.subr.bf16.mxu0 %v1824_v41 }
 0x309   : > { %v1748_v47 = vunpack.i.h.bf16 %v1746_v43  ;;  %v1747_v48 = vunpack.i.l.bf16 %v1746_v43  ;;  %1632 = vmatprep.subr.bf16.mxu1 %v1631_v42 }
 0x30a   : > { %1634 = vmatpush3.bf16.msra.mxu1 %v1631_v42 }
 0x30b   : > { %1636 = vmatprep.subr.bf16.mxu1 %v1635_v44  ;;  %v1639_v49 = vpack.c.bf16 %v1748_v47, %v1747_v48 }
 0x30e   : > { %1638 = vmatpush3.bf16.msra.mxu1 %v1635_v44 }
 0x30f   : > { %1640 = vmatprep.subr.bf16.mxu1 %v1639_v49 }
 0x312   : > { %1642 = vmatpush3.bf16.msra.mxu1 %v1639_v49  ;;  %v1826_v49 = vmov 0.0  }
 0x313   : > { %1592 = vmatprep.mubr.msk.f32.mxu0 %vm1825_vm13, %v1826_v49 }
 0x315   : > { %v1223_v52 = vpop.permute.xlu0 %1222  ;;  %1579 = vmatmul.mubr.msk.f32.vlgmr.msra.gmra.mrb[0].mxu1 %vm757_vm4, %v1008_v50 }
 0x316   : > { %v1240_v53 = vmul.f32 %v1223_v52, %v2116_v0  ;;  %1581 = vmatprep.mubr.msk.f32.mxu1 %vm757_vm4, %v1009_v51 }
 0x318   : > { %1248 = vrot.lane.b32.xlu0 %v1240_v53, %s1820_s1 }
 0x319   : > { %v1233_v55 = vpop.permute.xlu0 %1232  ;;  %v1228_v56 = vpop.permute.xlu1 %1227  ;;  %1582 = vmatmul.mubr.msk.f32.gmra.mrb[2].mxu1 %vm757_vm4, %v1010_v54 }
 0x31a   : > { %v1242_v57 = vmul.f32 %v1233_v55, %v2124_v10  ;;  %v1241_v58 = vmul.f32 %v1228_v56, %v2114_v61 }
 0x31c   : > { %1250 = vrot.lane.b32.xlu1 %v1241_v58, %s1820_s1  ;;  %1252 = vrot.lane.b32.xlu0 %v1242_v57, %s1820_s1 }
 0x31d   : > { %v1238_v59 = vpop.permute.xlu1 %1237  ;;  %v1135_v63 = vpop.permute.xlu0 %1134 }
 0x31e   : > { %v1243_v60 = vmul.f32 %v1238_v59, %v2122_v8 }
 0x320   : > { %1254 = vrot.lane.b32.xlu1 %v1243_v60, %s1820_s1  ;;  %991 = vrot.lane.b32.xlu0 %v2116_v0, %s1822_s25  ;;  %s1823_s1 = smov 6  }
 0x321   : > { %v1140_v62 = vpop.permute.xlu1 %1139  ;;  %v1159_v2 = vpop.permute.xlu0 %1158 }
 0x324   : > { %993 = vrot.lane.b32.xlu1 %v2114_v61, %s1822_s25  ;;  %995 = vrot.lane.b32.xlu0 %v2124_v10, %s1822_s25 }
 0x325   : > { %v1164_v1 = vpop.permute.xlu1 %1163  ;;  %v1145_v4 = vpop.permute.xlu0 %1144 }
 0x328   : > { %997 = vrot.lane.b32.xlu1 %v2122_v8, %s1822_s25  ;;  %s2204_s25 = scalar_lea.hbm %s2259_s13, %s1484_s24 }
 0x329   : > { %v1150_v3 = vpop.permute.xlu1 %1149  ;;  %v1191_v6 = vpop.permute.xlu0 %1190 }
 0x32d   : > { %v1196_v5 = vpop.permute.xlu1 %1195  ;;  %v1169_v9 = vpop.permute.xlu0 %1168 }
 0x331   : > { %v1174_v7 = vpop.permute.xlu1 %1173  ;;  %v1201_v14 = vpop.permute.xlu0 %1200 }
 0x335   : > { %v1206_v12 = vpop.permute.xlu1 %1205 }
 0x38a   : > { %v1249_v20 = vpop.permute.xlu0 %1248 }
 0x38e   : > { %v1251_v8 = vpop.permute.xlu1 %1250  ;;  %v1253_v35 = vpop.permute.xlu0 %1252 }
 0x392   : > { %v1255_v32 = vpop.permute.xlu1 %1254  ;;  %v992_v40 = vpop.permute.xlu0 %991 }
 0x393   : > { %v1003_v47 = vadd.f32 %v992_v40, %v2038_v33  ;;  %v1305_v33 = vld [vmem:[#allocation2] sm:$0x1] }
 0x396   : > { %v994_v39 = vpop.permute.xlu1 %993  ;;  %v996_v43 = vpop.permute.xlu0 %995 }
 0x397   : > { %v1004_v44 = vadd.f32 %v994_v39, %v2040_v36  ;;  %v1005_v54 = vadd.f32 %v996_v43, %v2047_v45 }
 0x39a   : > { %v998_v42 = vpop.permute.xlu1 %997 }
 0x39b   : > { %v1006_v53 = vadd.f32 %v998_v42, %v2049_v46 }
 0x3e8   : > { %v1580_v11 = vpop.f32.mrb[0].mxu1 }
 0x3e9   : > { %v1153_v13 = vmul.f32 %v1580_v11, %v1140_v62  ;;  %v1113_v0 = vpop.f32.mrb[1].mxu1 }
 0x3ea   : > { %v1152_v61 = vmul.f32 %v1135_v63, %v1113_v0 }
 0x3eb   : > { %v1177_v15 = vadd.f32 %v1164_v1, %v1153_v13 }
 0x3ec   : > { %v1176_v10 = vadd.f32 %v1159_v2, %v1152_v61  ;;  %v1583_v16 = vpop.f32.mrb[2].mxu1 }
 0x3ed   : > { %vm1181_vm9 = vcmp.gt.f32.partialorder %v1177_v15, 0.0  ;;  %v1209_v17 = vmul.f32 %v1196_v5, %v1177_v15  ;;  %v1155_v18 = vmul.f32 %v1583_v16, %v1150_v3  ;;  %v1123_v19 = vpop.f32.mrb[3].mxu1  ;;  %v1311_v5 = vlaneseq }
 0x3ee   : > { %vm1180_vm10 = vcmp.gt.f32.partialorder %v1176_v10, 0.0  ;;  %v1208_v21 = vmul.f32 %v1191_v6, %v1176_v10  ;;  %v1154_v22 = vmul.f32 %v1145_v4, %v1123_v19  ;;  %v1304_v4 = vld [vmem:[%s2257_s11] sm:$0x1] }
 0x3ef   : > { %v1179_v23 = vadd.f32 %v1174_v7, %v1155_v18  ;;  %v1213_v25 = vsel %vm1181_vm9, %v1177_v15, %v1209_v17  ;;  %v1312_v6 = vshrl.u32 %v1311_v5, 7 }
 0x3f0   : > { %v1178_v26 = vadd.f32 %v1169_v9, %v1154_v22  ;;  %v1261_v27 = vadd.f32 %v1251_v8, %v1213_v25  ;;  %v1212_v28 = vsel %vm1180_vm10, %v1176_v10, %v1208_v21 }
 0x3f1   : > { %vm1183_vm11 = vcmp.gt.f32.partialorder %v1179_v23, 0.0  ;;  %v1211_v29 = vmul.f32 %v1206_v12, %v1179_v23  ;;  %v1260_v30 = vadd.f32 %v1249_v20, %v1212_v28  ;;  %v1313_v7 = vsub.s32 0, %v1312_v6 }
 0x3f2   : > { %vm1182_vm12 = vcmp.gt.f32.partialorder %v1178_v26, 0.0  ;;  %v1210_v31 = vmul.f32 %v1201_v14, %v1178_v26  ;;  %1270 = vrot.lane.b32.xlu1 %v1261_v27, %s1823_s1 }
 0x3f3   : > { %1268 = vrot.lane.b32.xlu0 %v1260_v30, %s1823_s1  ;;  %v1215_v34 = vsel %vm1183_vm11, %v1179_v23, %v1211_v29 }
 0x3f4   : > { %v1263_v24 = vadd.f32 %v1255_v32, %v1215_v34  ;;  %v1214_v37 = vsel %vm1182_vm12, %v1178_v26, %v1210_v31 }
 0x3f5   : > { %v1262_v38 = vadd.f32 %v1253_v35, %v1214_v37 }
 0x3f6   : > { %1274 = vrot.lane.b32.xlu1 %v1263_v24, %s1823_s1 }
 0x3f7   : > { %1272 = vrot.lane.b32.xlu0 %v1262_v38, %s1823_s1  ;;  %s1393_s1 = scalar_lea.sflag [#allocation4], %s444_s23 }
 0x464   : > { %v1271_v48 = vpop.permute.xlu1 %1270 }
 0x465   : > { %v1281_v50 = vadd.f32 %v1271_v48, %v1004_v44  ;;  %v1269_v51 = vpop.permute.xlu0 %1268 }
 0x466   : > { %v1280_v52 = vadd.f32 %v1269_v51, %v1003_v47 }
 0x467   : > { %1290 = vrot.lane.b32.xlu1 %v1281_v50, %s1827_s26 }
 0x468   : > { %v1275_v55 = vpop.permute.xlu1 %1274  ;;  %1288 = vrot.lane.b32.xlu0 %v1280_v52, %s1827_s26 }
 0x469   : > { %v1283_v56 = vadd.f32 %v1275_v55, %v1006_v53  ;;  %v1273_v57 = vpop.permute.xlu0 %1272 }
 0x46a   : > { %v1282_v36 = vadd.f32 %v1273_v57, %v1005_v54 }
 0x46b   : > { %1294 = vrot.lane.b32.xlu1 %v1283_v56, %s1827_s26 }
 0x46c   : > { %1292 = vrot.lane.b32.xlu0 %v1282_v36, %s1827_s26  ;;  %s1751_s26 = scalar_lea.vmem %s2206_s17, 16 }
 0x46d   : > { %p1752_p11 = scmp.ne.s32.totalorder %s2206_s17, %s1751_s26  ;;  %p1759_p1 = scmp.lt.s32.totalorder %s1757_s2, %s1751_s26 }
 0x46f   : > { %p1753_p12 = pnand %p1752_p11, %p1940_p5  ;;  %p1760_p2 = por %p1759_p1, %p1758_p0 }
 0x470   : > { %1308 = vperm.xlu0 %1708, %v1305_v33  }
 0x471   : > { %p1754_p13 = pneg %p1753_p12 }
 0x473   : > { %p1761_p3 = pnand %p1760_p2, %p1754_p13 }
 0x4d9   : > { %v1291_v58 = vpop.permute.xlu1 %1290 }
 0x4da   : > { %v1301_v59 = vadd.f32 %v1291_v58, %v1261_v27  ;;  %v1289_v60 = vpop.permute.xlu0 %1288 }
 0x4db   : > { %v1300_v62 = vadd.f32 %v1289_v60, %v1260_v30 }
 0x4dd   : > { %v1644_v63 = vpack.c.bf16 %v1301_v59, %v1300_v62  ;;  %v1295_v1 = vpop.permute.xlu1 %1294 }
 0x4de   : > { %v1303_v46 = vadd.f32 %v1295_v1, %v1263_v24  ;;  %v1293_v2 = vpop.permute.xlu0 %1292 }
 0x4df   : > { %v1302_v3 = vadd.f32 %v1293_v2, %v1262_v38  ;;  %1645 = vmatpush3.bf16.msra.mxu0 %v1644_v63 }
 0x4e0   : > { %1646 = vmatprep.subr.bf16.mxu0 %v1824_v41 }
 0x4e1   : > { %v1647_v45 = vpack.c.bf16 %v1303_v46, %v1302_v3 }
 0x4e3   : > { %1648 = vmatpush3.bf16.msra.mxu0 %v1647_v45 }
 0x4e6   : > { %1593 = vmatmul.mubr.msk.f32.vlgmr.msra.gmra.mrb[4].mxu0 %vm1315_vm14, %v1304_v4 }
 0x4ef   : > { %v1309_v9 = vpop.permute.xlu0 %1308 }
 0x4f0   : > { %v1314_v11 = vrot.slane %v1309_v9, %v1313_v7 }
 0x5b9   : > { %v1385_v12 = vpop.f32.mrb[4].mxu0 }
 0x5ba   : > { %v1386_v13 = vadd.f32 %v1385_v12, %v1314_v11  ;;  %v1594_v0 = vpop.f32.mrb[5].mxu0 }
 0x5bc   : > { %1749 = vtanh.f32 %v1386_v13 }
 0x5c6   : > { %v1750_v14 = vpop.eup %1749 }
 0x5c7   : > { %1391 = vst.msk [vmem:[%s445_s16] sm:$0x1] %vm1390_vm15, %v1750_v14 }
 0x5c8   : > { %1764 = shalt.err (!%p1761_p3)
}
 0x5c9   : > { %s1765_s23 = scalar_lea.hbm %s2204_s25, 16  ;;  %s1769_s21 = scalar_lea.hbm %s2259_s13, 32 }
 0x5ca   : > { %p1766_p4 = scmp.ne.s32.totalorder %s2204_s25, %s1765_s23  ;;  %p1770_p9 = scmp.lt.u32.totalorder %s2204_s25, %s2259_s13 }
 0x5cb   : > { %p1771_p10 = scmp.lt.u32.totalorder %s1769_s21, %s1765_s23  ;;  %p1773_p12 = scmp.lt.u32.totalorder %s1765_s23, %s2204_s25 }
 0x5cc   : > { %p1767_p7 = pnand %p1766_p4, %p1940_p5 }
 0x5cd   : > { %p1772_p11 = por %p1771_p10, %p1770_p9 }
 0x5ce   : > { %p1768_p8 = pneg %p1767_p7 }
 0x5cf   : > { %p1774_p13 = por %p1773_p12, %p1772_p11 }
 0x5d1   : > { %p1775_p0 = pnand %p1774_p13, %p1768_p8 }
 0x5d3   : > { %1778 = shalt.err (!%p1775_p0)
}
 0x5d4   : > { %1650 = dma.vmem_to_hbm [thread:$0]  (%p1940_p5), %s2206_s17, 16, %s2204_s25, %s1393_s1  }
 0x5d5 PF: > { %p1656_p1 = scmp.ge.s32.totalorder %s1813_s30, 2  ;;  %s1417_s26 = sand.u32 1, %s1801_s27  }
 0x5d6   : > { %s1418_s14 = scalar_lea.sflag [#allocation4], %s1417_s26 }
 0x5d7   : > { %p1653_p2 = pnand %p1656_p1, %p1944_p6 }
 0x5d9   : > { %1796 = dma.done.wait (!%p1653_p2), %s1418_s14, 16  }
 0x5da   : > { %1798 = vsyncadd (!%p1653_p2), %s1418_s14, 4294967280  ;;  %p25_p3 = scmp.ge.s32.totalorder %s1927_s15, 4   ;;  %s2266_s27 = smov %s1805_s28 }
 0x5db   : > { %s2267_s28 = smov %s1809_s29  ;;  %s2268_s29 = smov %s1938_s18 }
 0x5dc   : > { %s2269_s30 = smov %s1927_s15  ;;  %27 = sbr.rel (!%p25_p3) target bundleno = 6 (0x6), region = 110 }
 0x5e3   :  { %1422 = vsyncpa [#allocation4], 1 }
 0x5e4   :  { %1424 = vsyncpa [#allocation4 + $0x1], 1 }

</bundles_post_ra>
